<compile_context>
chip_gen: v5e
topology: v5e:2x2
jax: 0.10.0
libtpu: 0.0.40
codegen_flags: <defaults>
</compile_context>

<pallas_src>
import functools
import math

import jax
import jax.numpy as jnp
import numpy as np
from jax import lax
from jax.experimental import pallas as pl
from jax.experimental.pallas import tpu as pltpu

_INV_LN10 = 1.0 / math.log(10.0)


def _comb_stats_kernel(p_ref, t_ref, out_ref, *, beta, n_rows, ragged):
    """Masked per-block partial sums over a lane-dense folded block.

    p_ref, t_ref : (tile_r, Wf) block of the folded [Tf, Wf] view (Wf % 128 == 0).
    out_ref      : (4, Wf): row 0=count, 1=sse, 2=count_log, 3=sse_log (ln units).
    """
    p = p_ref[...]
    t = t_ref[...]

    if ragged:
        # Last block may read past Tf (garbage rows): poison t so both masks
        # drop those rows.  Only compiled in when Tf % tile_r != 0.
        i = pl.program_id(0)
        tile_r = t.shape[0]
        row = lax.broadcasted_iota(jnp.int32, t.shape, 0) + i * tile_r
        t = jnp.where(row < n_rows, t, jnp.nan)

    # --- plain RMSE stats (mask = target not NaN) ---
    mask = t == t
    d = p - t
    out_ref[0:1, :] = jnp.sum(jnp.where(mask, 1.0, 0.0), axis=0, keepdims=True)
    out_ref[1:2, :] = jnp.sum(jnp.where(mask, d * d, 0.0), axis=0, keepdims=True)

    # --- log-sqrt RMSE stats ---
    # log10(a) - log10(b) == ln(a/b) / ln(10); the (1/ln10)^2 scale is applied
    # in the JAX finalize so the kernel does a single log per element.
    sp = jnp.sqrt(p + beta) + 0.1
    st = jnp.sqrt(t + beta) + 0.1
    d1 = jnp.log(sp / st)
    # mask1 == ~isnan(log10(sqrt(t+beta)+0.1)): false iff t is NaN or t+beta < 0.
    mask1 = (t + beta) >= 0.0
    out_ref[2:3, :] = jnp.sum(jnp.where(mask1, 1.0, 0.0), axis=0, keepdims=True)
    out_ref[3:4, :] = jnp.sum(jnp.where(mask1, d1 * d1, 0.0), axis=0, keepdims=True)


def rmse_loss_comb8(output, target, alpha, gamma=0.01, beta=1e-6, tile_r=None):
    """output, target: [T, Ngage, ny]. Returns scalar f32 loss (sum over channels)."""
    T, Ngage, ny = target.shape
    assert output.shape == target.shape
    W = Ngage * ny

    p = output.astype(jnp.float32)
    t = target.astype(jnp.float32)

    # Lane-dense fold: [T, W] -> [Tf, Wf], Wf = f*W a multiple of 128, so every
    # vreg lane is used and VMEM blocks are not lane-padded.  Free reshape
    # (row-major contiguous) when T % f == 0.
    f = 128 // math.gcd(W, 128)
    Wf = f * W
    T_pad = ((T + f - 1) // f) * f
    p2d = p.reshape(T, W)
    t2d = t.reshape(T, W)
    if T_pad != T:
        # TODO(synk): this pad materializes an HBM copy; choose T % f == 0
        # upstream to keep the kernel's HBM read the only full-tensor traffic.
        p2d = jnp.pad(p2d, ((0, T_pad - T), (0, 0)))
        t2d = jnp.pad(t2d, ((0, T_pad - T), (0, 0)), constant_values=float("nan"))
    Tf = T_pad // f
    p2d = p2d.reshape(Tf, Wf)
    t2d = t2d.reshape(Tf, Wf)

    if tile_r is None:
        # ~4 MiB per f32 input block: 2 inputs x 2 pipeline buffers ~= 16 MiB,
        # within scoped VMEM on v5e/v6e and well under v7x's 64 MiB physical.
        target_block_bytes = 4 * 1024 * 1024
        tile_r = max(8, (target_block_bytes // (Wf * 4)) // 8 * 8)
        tile_r = min(tile_r, ((Tf + 7) // 8) * 8)
        if pl.cdiv(Tf, tile_r) == 1 and Tf > 8:
            # >= 2 blocks so the parallel grid axis can shard across v7x's 2 TCs.
            tile_r = max(8, (((Tf + 1) // 2) + 7) // 8 * 8)
    num_blocks = pl.cdiv(Tf, tile_r)
    ragged = (Tf % tile_r) != 0

    stats = pl.pallas_call(
        functools.partial(_comb_stats_kernel, beta=float(beta), n_rows=Tf, ragged=ragged),
        out_shape=jax.ShapeDtypeStruct((num_blocks, 4, Wf), jnp.float32),
        grid=(num_blocks,),
        in_specs=[
            pl.BlockSpec((tile_r, Wf), lambda i: (i, 0)),
            pl.BlockSpec((tile_r, Wf), lambda i: (i, 0)),
        ],
        out_specs=pl.BlockSpec((None, 4, Wf), lambda i: (i, 0, 0)),
        compiler_params=pltpu.CompilerParams(
            dimension_semantics=("parallel",),
            vmem_limit_bytes=32 * 1024 * 1024,
        ),
    )(p2d, t2d)

    # ---- tiny finalize in JAX (a few KB of partials) ----
    per_lane = jnp.sum(stats, axis=0)                              # (4, Wf)
    per_ch = per_lane.reshape(4, f, Ngage, ny).sum(axis=(1, 2))    # (4, ny)
    n_valid = per_ch[0]
    sse = per_ch[1]
    n_valid1 = per_ch[2]
    sse1 = per_ch[3] * (_INV_LN10 * _INV_LN10)                     # ln -> log10 scale

    loss_rmse = jnp.sqrt(sse / n_valid)                            # (ny,)
    loss_log_sqrt_rmse = jnp.sqrt(sse1 / n_valid1)                 # (ny,)

    # ---- pbias-low: bottom-30% selection per channel ----
    # TODO(synk): torch.sort has no Pallas TPU lowering; bottom-k selection via
    # negated lax.top_k in XLA (static k upper bound, masked to dynamic n_low),
    # reusing n_valid from the stats kernel.
    N = T * Ngage
    k_sel = max(1, min(N, int(math.ceil(0.3 * N))))                # static bound >= n_low
    p_t = p.reshape(N, ny).T                                       # (ny, N)
    t_t = t.reshape(N, ny).T
    valid_t = t_t == t_t
    neg_inf = jnp.float32(-jnp.inf)
    sp_low = -lax.top_k(jnp.where(valid_t, -p_t, neg_inf), k_sel)[0]   # smallest p, ascending
    st_low = -lax.top_k(jnp.where(valid_t, -t_t, neg_inf), k_sel)[0]   # smallest t, ascending
    n_low = (3 * n_valid.astype(jnp.int32)) // 10                  # == int(0.3 * n_valid)
    low = jnp.arange(k_sel, dtype=jnp.int32)[None, :] < n_low[:, None]
    num_sum = jnp.sum(jnp.where(low, sp_low - st_low, 0.0), axis=1)
    den_sum = jnp.sum(jnp.where(low, jnp.abs(st_low), 0.0), axis=1)
    pbias_low = jnp.abs(num_sum / den_sum) * 100.0

    combined = (1.0 - alpha) * loss_rmse + alpha * loss_log_sqrt_rmse + gamma * pbias_low
    return jnp.sum(combined)


def _reference(output, target, alpha, gamma=0.01, beta=1e-6):
    """NumPy mirror of the PyTorch RmseLossComb8.forward loop."""
    out = np.asarray(jax.device_get(output), dtype=np.float64)
    tgt = np.asarray(jax.device_get(target), dtype=np.float64)
    ny = tgt.shape[2]
    total = 0.0
    for k in range(ny):
        p0 = out[:, :, k]
        t0 = tgt[:, :, k]
        p1 = np.log10(np.sqrt(p0 + beta) + 0.1)
        t1 = np.log10(np.sqrt(t0 + beta) + 0.1)
        mask = ~np.isnan(t0)
        p = p0[mask]
        t = t0[mask]
        loss_rmse = np.sqrt(np.mean((p - t) ** 2))
        mask1 = ~np.isnan(t1)
        pa = p1[mask1]
        ta = t1[mask1]
        loss_log = np.sqrt(np.mean((pa - ta) ** 2))
        num_elements = int(0.3 * t.size)
        sp = np.sort(p)
        st = np.sort(t)
        pbias = np.abs(
            np.sum(sp[:num_elements] - st[:num_elements])
            / np.sum(np.abs(st[:num_elements]))
        ) * 100.0
        total += (1.0 - alpha) * loss_rmse + alpha * loss_log + gamma * pbias
    return total


if __name__ == "__main__":
    key = jax.random.PRNGKey(0)
    k1, k2, k3 = jax.random.split(key, 3)

    T, Ngage, ny = 300, 8, 2          # small, module-consistent shapes
    output = jax.random.uniform(k1, (T, Ngage, ny), jnp.float32, minval=0.05, maxval=2.0)
    target = jax.random.uniform(k2, (T, Ngage, ny), jnp.float32, minval=0.05, maxval=2.0)

    # Sprinkle NaNs into target to exercise the masking path.
    nan_mask = jax.random.bernoulli(k3, p=0.2, shape=(T, Ngage, ny))
    target = jnp.where(nan_mask, jnp.nan, target)

    alpha = 0.25
    # T=300 with fold factor f=8 exercises the NaN-pad path, and the auto tile
    # gives 2 blocks with a ragged last block (exercises the row-mask path).
    loss = rmse_loss_comb8(output, target, alpha=alpha)
    loss = jax.block_until_ready(loss)

    ref = _reference(output, target, alpha=alpha)
    rel_err = abs(float(loss) - float(ref)) / max(1e-6, abs(float(ref)))
    assert rel_err < 2e-3, (float(loss), float(ref), rel_err)

    print("KERNEL_OK")
</pallas_src>

<mosaic_0001>
module attributes {stable_mosaic.version = 11 : i64} {
  func.func @_comb_stats_kernel(%arg0: i32, %arg1: memref<24x128xf32, #tpu.memory_space<vmem>>, %arg2: memref<24x128xf32, #tpu.memory_space<vmem>>, %arg3: memref<1x4x128xf32, #tpu.memory_space<vmem>>) attributes {dimension_semantics = [#tpu.dimension_semantics<parallel>], iteration_bounds = array<i64: 2>, scalar_prefetch = 0 : i64, scratch_operands = 0 : i64, tpu.core_type = #tpu.core_type<tc>, window_params = [{transform_indices = @transform_0, window_bounds = array<i64: 24, 128>}, {transform_indices = @transform_1, window_bounds = array<i64: 24, 128>}, {transform_indices = @transform_2, window_bounds = array<i64: 1, 4, 128>}]} {
    %c0 = arith.constant 0 : index
    %c0_0 = arith.constant 0 : index
    %0 = vector.load %arg1[%c0, %c0_0] : memref<24x128xf32, #tpu.memory_space<vmem>>, vector<24x128xf32>
    %c0_1 = arith.constant 0 : index
    %c0_2 = arith.constant 0 : index
    %1 = vector.load %arg2[%c0_1, %c0_2] : memref<24x128xf32, #tpu.memory_space<vmem>>, vector<24x128xf32>
    %2 = tpu.iota {dimensions = array<i32: 0>} : vector<24x128xi32>
    %c24_i32 = arith.constant 24 : i32
    %3 = arith.muli %arg0, %c24_i32 : i32
    %4 = vector.broadcast %3 : i32 to vector<24x128xi32>
    %5 = arith.addi %2, %4 : vector<24x128xi32>
    %c38_i32 = arith.constant 38 : i32
    %6 = vector.broadcast %c38_i32 : i32 to vector<24x128xi32>
    %7 = arith.cmpi slt, %5, %6 : vector<24x128xi32>
    %cst = arith.constant 0x7FC00000 : f32
    %8 = vector.broadcast %cst : f32 to vector<24x128xf32>
    %9 = arith.select %7, %1, %8 : vector<24x128xi1>, vector<24x128xf32>
    %10 = arith.cmpf oeq, %9, %9 : vector<24x128xf32>
    %11 = arith.subf %0, %9 : vector<24x128xf32>
    %cst_3 = arith.constant 1.000000e+00 : f32
    %cst_4 = arith.constant 0.000000e+00 : f32
    %12 = vector.broadcast %cst_3 : f32 to vector<24x128xf32>
    %13 = vector.broadcast %cst_4 : f32 to vector<24x128xf32>
    %14 = arith.select %10, %12, %13 : vector<24x128xi1>, vector<24x128xf32>
    %cst_5 = arith.constant dense<0.000000e+00> : vector<128xf32>
    %15 = vector.multi_reduction <add>, %14, %cst_5 [0] : vector<24x128xf32> to vector<128xf32>
    %16 = vector.shape_cast %15 : vector<128xf32> to vector<1x128xf32>
    %c0_6 = arith.constant 0 : index
    %c0_7 = arith.constant 0 : index
    %c0_8 = arith.constant 0 : index
    %17 = vector.load %arg3[%c0_6, %c0_7, %c0_8] : memref<1x4x128xf32, #tpu.memory_space<vmem>>, vector<1x1x128xf32>
    %18 = vector.shape_cast %17 : vector<1x1x128xf32> to vector<1x128xf32>
    %19 = vector.shape_cast %16 : vector<1x128xf32> to vector<1x1x128xf32>
    tpu.vector_store %arg3[%c0_6, %c0_7, %c0_8], %19 {strides = array<i32>} : memref<1x4x128xf32, #tpu.memory_space<vmem>>, vector<1x1x128xf32>,
    %20 = arith.mulf %11, %11 : vector<24x128xf32>
    %cst_9 = arith.constant 0.000000e+00 : f32
    %21 = vector.broadcast %cst_9 : f32 to vector<24x128xf32>
    %22 = arith.select %10, %20, %21 : vector<24x128xi1>, vector<24x128xf32>
    %cst_10 = arith.constant dense<0.000000e+00> : vector<128xf32>
    %23 = vector.multi_reduction <add>, %22, %cst_10 [0] : vector<24x128xf32> to vector<128xf32>
    %24 = vector.shape_cast %23 : vector<128xf32> to vector<1x128xf32>
    %c0_11 = arith.constant 0 : index
    %c1 = arith.constant 1 : index
    %c0_12 = arith.constant 0 : index
    %25 = vector.load %arg3[%c0_11, %c1, %c0_12] : memref<1x4x128xf32, #tpu.memory_space<vmem>>, vector<1x1x128xf32>
    %26 = vector.shape_cast %25 : vector<1x1x128xf32> to vector<1x128xf32>
    %27 = vector.shape_cast %24 : vector<1x128xf32> to vector<1x1x128xf32>
    tpu.vector_store %arg3[%c0_11, %c1, %c0_12], %27 {strides = array<i32>} : memref<1x4x128xf32, #tpu.memory_space<vmem>>, vector<1x1x128xf32>,
    %cst_13 = arith.constant 9.99999997E-7 : f32
    %28 = vector.broadcast %cst_13 : f32 to vector<24x128xf32>
    %29 = arith.addf %0, %28 : vector<24x128xf32>
    %30 = math.sqrt %29 : vector<24x128xf32>
    %cst_14 = arith.constant 1.000000e-01 : f32
    %31 = vector.broadcast %cst_14 : f32 to vector<24x128xf32>
    %32 = arith.addf %30, %31 : vector<24x128xf32>
    %cst_15 = arith.constant 9.99999997E-7 : f32
    %33 = vector.broadcast %cst_15 : f32 to vector<24x128xf32>
    %34 = arith.addf %9, %33 : vector<24x128xf32>
    %35 = math.sqrt %34 : vector<24x128xf32>
    %cst_16 = arith.constant 1.000000e-01 : f32
    %36 = vector.broadcast %cst_16 : f32 to vector<24x128xf32>
    %37 = arith.addf %35, %36 : vector<24x128xf32>
    %38 = arith.divf %32, %37 : vector<24x128xf32>
    %39 = math.log %38 : vector<24x128xf32>
    %cst_17 = arith.constant 9.99999997E-7 : f32
    %40 = vector.broadcast %cst_17 : f32 to vector<24x128xf32>
    %41 = arith.addf %9, %40 : vector<24x128xf32>
    %cst_18 = arith.constant 0.000000e+00 : f32
    %42 = vector.broadcast %cst_18 : f32 to vector<24x128xf32>
    %43 = arith.cmpf oge, %41, %42 : vector<24x128xf32>
    %cst_19 = arith.constant 1.000000e+00 : f32
    %cst_20 = arith.constant 0.000000e+00 : f32
    %44 = vector.broadcast %cst_19 : f32 to vector<24x128xf32>
    %45 = vector.broadcast %cst_20 : f32 to vector<24x128xf32>
    %46 = arith.select %43, %44, %45 : vector<24x128xi1>, vector<24x128xf32>
    %cst_21 = arith.constant dense<0.000000e+00> : vector<128xf32>
    %47 = vector.multi_reduction <add>, %46, %cst_21 [0] : vector<24x128xf32> to vector<128xf32>
    %48 = vector.shape_cast %47 : vector<128xf32> to vector<1x128xf32>
    %c0_22 = arith.constant 0 : index
    %c2 = arith.constant 2 : index
    %c0_23 = arith.constant 0 : index
    %49 = vector.load %arg3[%c0_22, %c2, %c0_23] : memref<1x4x128xf32, #tpu.memory_space<vmem>>, vector<1x1x128xf32>
    %50 = vector.shape_cast %49 : vector<1x1x128xf32> to vector<1x128xf32>
    %51 = vector.shape_cast %48 : vector<1x128xf32> to vector<1x1x128xf32>
    tpu.vector_store %arg3[%c0_22, %c2, %c0_23], %51 {strides = array<i32>} : memref<1x4x128xf32, #tpu.memory_space<vmem>>, vector<1x1x128xf32>,
    %52 = arith.mulf %39, %39 : vector<24x128xf32>
    %cst_24 = arith.constant 0.000000e+00 : f32
    %53 = vector.broadcast %cst_24 : f32 to vector<24x128xf32>
    %54 = arith.select %43, %52, %53 : vector<24x128xi1>, vector<24x128xf32>
    %cst_25 = arith.constant dense<0.000000e+00> : vector<128xf32>
    %55 = vector.multi_reduction <add>, %54, %cst_25 [0] : vector<24x128xf32> to vector<128xf32>
    %56 = vector.shape_cast %55 : vector<128xf32> to vector<1x128xf32>
    %c0_26 = arith.constant 0 : index
    %c3 = arith.constant 3 : index
    %c0_27 = arith.constant 0 : index
    %57 = vector.load %arg3[%c0_26, %c3, %c0_27] : memref<1x4x128xf32, #tpu.memory_space<vmem>>, vector<1x1x128xf32>
    %58 = vector.shape_cast %57 : vector<1x1x128xf32> to vector<1x128xf32>
    %59 = vector.shape_cast %56 : vector<1x128xf32> to vector<1x1x128xf32>
    tpu.vector_store %arg3[%c0_26, %c3, %c0_27], %59 {strides = array<i32>} : memref<1x4x128xf32, #tpu.memory_space<vmem>>, vector<1x1x128xf32>,
    return
  }
  func.func @transform_0(%arg0: i32) -> (i32, i32) {
    %c0_i32 = arith.constant 0 : i32
    %c0_i32_0 = arith.constant 0 : i32
    return %arg0, %c0_i32 : i32, i32
  }
  func.func @transform_1(%arg0: i32) -> (i32, i32) {
    %c0_i32 = arith.constant 0 : i32
    %c0_i32_0 = arith.constant 0 : i32
    return %arg0, %c0_i32 : i32, i32
  }
  func.func @transform_2(%arg0: i32) -> (i32, i32, i32) {
    %c0_i32 = arith.constant 0 : i32
    %c0_i32_0 = arith.constant 0 : i32
    %c0_i32_1 = arith.constant 0 : i32
    return %arg0, %c0_i32, %c0_i32_0 : i32, i32, i32
  }
}

</mosaic_0001>

<bundles_post_ra>
// kernel: tpu_custom_call.1
= control target key start
LH: loop header
LB: loop body
LE: loop exit
PB: predicated region body
PF: predicated region fallthrough
CT: control target
= control target key end

     0   :  { %7 = vsyncpa [#allocation3], 0  ;;  %s1129_s0 = inlined_call_operand.hbm [shape: f32[38,128], index: 0, kind: input, shape index: {}]   ;;  %s1130_s1 = inlined_call_operand.hbm [shape: f32[38,128], index: 1, kind: input, shape index: {}]   ;;  %s1131_s2 = inlined_call_operand.hbm [shape: f32[2,4,128], index: 2, kind: output, shape index: {}]  }
   0x1   :  { %9 = vsyncpa [#allocation3 + $0x1], 0 }
   0x2   :  { %10 = vsyncpa [#allocation6], 0 }
   0x3   :  { %12 = vsyncpa [#allocation6 + $0x1], 0 }
   0x4   :  { %13 = vsyncpa [#allocation4], 0 }
   0x5   :  { %15 = vsyncpa [#allocation4 + $0x1], 0  ;;  %s824_s9 = smov 0   ;;  %s826_s10 = smov 0  }
   0x6   :  { %s828_s11 = smov 0   ;;  %s830_s12 = smov 0  }
   0x7 LB: > { %s845_s13 = sadd.s32 4294967295, %s800_s12   ;;  %s558_s14 = sadd.s32 4294967294, %s800_s12   ;;  %s800_s12 = sphi %s830_s12, %s1144_s12   ;;  %s796_s11 = sphi %s828_s11, %s1143_s11   ;;  %s792_s10 = sphi %s826_s10, %s1142_s10   ;;  %s788_s9 = sphi %s824_s9, %s1141_s9  }
   0x8   : > { %s849_s15 = sadd.s32 1, %s800_s12   ;;  %s28_s16 = sadd.s32 1, %s796_s11 }
   0x9   : > { %s25_s17 = ssub.s32 %s800_s12, %s849_s15  ;;  %p35_p0 = scmp.ne.s32.totalorder %s796_s11, %s792_s10 }
   0xa   : > { %p26_p1 = scmp.eq.s32.totalorder %s25_s17, 0  ;;  %p36_p2 = scmp.eq.s32.totalorder %s800_s12, 0 }
   0xb   : > { %p41_p3 = scmp.ne.s32.totalorder %s792_s10, %s788_s9  ;;  %p42_p4 = scmp.eq.s32.totalorder %s845_s13, 0 }
   0xc   : > { %s861_s18 = scalar_select %p26_p1, %s796_s11, %s28_s16  }
   0xd   : > { %p863_p5 = por %p36_p2, %p35_p0  ;;  %p867_p6 = por %p42_p4, %p41_p3 }
   0xe   : > { %p91_p7 = scmp.eq.s32.totalorder %s845_s13, 1  ;;  %p97_p8 = scmp.eq.s32.totalorder %s558_s14, 1 }
   0xf   : > { %p1132_p11 = scmp.ge.s32.totalorder %s800_s12, 2 }
  0x10   : > { %p872_p9 = por %p91_p7, %p35_p0  ;;  %p876_p10 = por %p97_p8, %p41_p3 }
  0x11   : > { %113 = sbr.rel (%p1132_p11) target bundleno = 98 (0x62), region = 16 }
  0x12   : > { %s1136_s22 = scalar_select %p876_p10, 1, 0 }
  0x16   : > { %116 = sbr.rel (!%p863_p5) target bundleno = 60 (0x3c), region = 20  ;;  %s117_s23 = sand.u32 (%p863_p5), 1, %s796_s11  }
  0x17   : > { %s122_s24 = smul.u32 (%p863_p5), 3, %s800_s12  ;;  %s890_s30 = scalar_lea.sflag (%p863_p5), [#allocation3], %s117_s23 }
  0x18   : > { %s579_s25 = smul.u32 (%p863_p5), 24, %s117_s23 }
  0x19   : > { %s123_s26 = ssub.s32 (%p863_p5), 5, %s122_s24 }
  0x1a   : > { %p124_p12 = scmp.lt.s32.totalorder (%p863_p5), %s123_s26, 3  ;;  %s121_s3 = scalar_lea.vmem (%p863_p5), [#allocation2], %s579_s25 }
  0x1c   : > { %s1146_s26 = smov (!%p124_p12, %s123_s26), 3 }
  0x1d   : > { %s561_s27 = sshll.u32 %s1146_s26, 3 }
  0x1e   : > { %s127_s28 = ssub.s32 24, %s561_s27 }
  0x1f   : > { %s128_s29 = sshll.u32 %s127_s28, 4 }
  0x20   : > { %129 = vsyncadd %s890_s30, %s128_s29  ;;  %p893_p13 = scmp.ne.s32.totalorder %s561_s27, 0  ;;  %s577_s5 = smul.u32 24, %s800_s12 }
  0x21   : > { %s898_s6 = sshll.u32 %s121_s3, 4  ;;  %s565_s7 = sshll.u32 %s1146_s26, 7  ;;  %s137_s6 = int_to_ptr.vmem [resolvable:$true] %s898_s6 }
  0x22   : > { %s132_s16 = scalar_lea.hbm %s1129_s0, %s577_s5  ;;  %s654_s24 = sshrl.u32 %s565_s7, 4 }
  0x23   : > { %s134_s17 = sshll.u32 %s132_s16, 4  ;;  %s663_s29 = scalar_lea.hbm %s1129_s0, 40  ;;  %s905_s17 = int_to_ptr.hbm [resolvable:$true] %s134_s17 }
  0x24   : > { %s652_s23 = sshra.s32 %s905_s17, 4  ;;  %s653_s23 = int_to_ptr.hbm [resolvable:$true] %s652_s23 }
  0x25   : > { %s659_s25 = scalar_lea.hbm %s653_s23, %s654_s24  ;;  %p664_p3 = scmp.lt.s32.totalorder %s653_s23, %s1129_s0 }
  0x26   : > { %p660_p0 = scmp.ne.s32.totalorder %s653_s23, %s659_s25  ;;  %p665_p4 = scmp.lt.s32.totalorder %s663_s29, %s659_s25 }
  0x28   : > { %p661_p1 = pnand %p660_p0, %p893_p13  ;;  %p666_p7 = por %p665_p4, %p664_p3 }
  0x2a   : > { %p662_p2 = pneg %p661_p1 }
  0x2c   : > { %p667_p8 = pnand %p666_p7, %p662_p2 }
  0x2e   : > { %670 = shalt.err (!%p667_p8)
}
  0x2f   : > { %s671_s8 = sshra.s32 %s137_s6, 4  ;;  %s802_s16 = smov [#allocation2]   ;;  %s672_s8 = int_to_ptr.vmem [resolvable:$true] %s671_s8 }
  0x30   : > { %s678_s14 = scalar_lea.vmem %s672_s8, %s654_s24  ;;  %s682_s27 = scalar_lea.vmem %s802_s16, 48 }
  0x31   : > { %p679_p12 = scmp.ne.s32.totalorder %s672_s8, %s678_s14  ;;  %p684_p11 = scmp.lt.s32.totalorder %s682_s27, %s678_s14 }
  0x33   : > { %p680_p0 = pnand %p679_p12, %p893_p13 }
  0x35   : > { %p681_p1 = pneg %p680_p0 }
  0x37   : > { %p686_p10 = pnand %p684_p11, %p681_p1 }
  0x39   : > { %689 = shalt.err (!%p686_p10)
}
  0x3a   : > { %s803_s23 = smov 128   ;;  %s804_s25 = smov 8  }
  0x3b   : > { %142 = dma.hbm_to_vmem [thread:$0]  (%p893_p13), %s905_s17, %s565_s7, %s137_s6, %s890_s30, %s803_s23, %s803_s23, %s804_s25  }
  0x3c PF: > { %145 = sbr.rel (!%p863_p5) target bundleno = 98 (0x62), region = 24  ;;  %s146_s24 = sand.u32 (%p863_p5), 1, %s796_s11  }
  0x3d   : > { %s151_s28 = smul.u32 (%p863_p5), 3, %s800_s12  ;;  %s937_s14 = scalar_lea.sflag (%p863_p5), [#allocation6], %s146_s24 }
  0x3e   : > { %s580_s29 = smul.u32 (%p863_p5), 24, %s146_s24 }
  0x3f   : > { %s152_s3 = ssub.s32 (%p863_p5), 5, %s151_s28 }
  0x40   : > { %p153_p10 = scmp.lt.s32.totalorder (%p863_p5), %s152_s3, 3  ;;  %s150_s26 = scalar_lea.vmem (%p863_p5), [#allocation5], %s580_s29 }
  0x42   : > { %s1148_s3 = smov (!%p153_p10, %s152_s3), 3 }
  0x43   : > { %s566_s5 = sshll.u32 %s1148_s3, 3 }
  0x44   : > { %s156_s8 = ssub.s32 24, %s566_s5 }
  0x45   : > { %s157_s4 = sshll.u32 %s156_s8, 4 }
  0x46   : > { %158 = vsyncadd %s937_s14, %s157_s4  ;;  %p940_p5 = scmp.ne.s32.totalorder %s566_s5, 0  ;;  %s578_s30 = smul.u32 24, %s800_s12 }
  0x47   : > { %s945_s6 = sshll.u32 %s150_s26, 4  ;;  %s570_s7 = sshll.u32 %s1148_s3, 7  ;;  %s166_s6 = int_to_ptr.vmem [resolvable:$true] %s945_s6 }
  0x48   : > { %s161_s27 = scalar_lea.hbm %s1130_s1, %s578_s30  ;;  %s693_s24 = sshrl.u32 %s570_s7, 4 }
  0x49   : > { %s163_s23 = sshll.u32 %s161_s27, 4  ;;  %s702_s8 = scalar_lea.hbm %s1130_s1, 40  ;;  %s952_s23 = int_to_ptr.hbm [resolvable:$true] %s163_s23 }
  0x4a   : > { %s691_s25 = sshra.s32 %s952_s23, 4  ;;  %s692_s25 = int_to_ptr.hbm [resolvable:$true] %s691_s25 }
  0x4b   : > { %s698_s28 = scalar_lea.hbm %s692_s25, %s693_s24  ;;  %p703_p3 = scmp.lt.s32.totalorder %s692_s25, %s1130_s1 }
  0x4c   : > { %p699_p11 = scmp.ne.s32.totalorder %s692_s25, %s698_s28  ;;  %p704_p4 = scmp.lt.s32.totalorder %s702_s8, %s698_s28 }
  0x4e   : > { %p700_p13 = pnand %p699_p11, %p940_p5  ;;  %p705_p7 = por %p704_p4, %p703_p3 }
  0x50   : > { %p701_p2 = pneg %p700_p13 }
  0x52   : > { %p706_p8 = pnand %p705_p7, %p701_p2 }
  0x54   : > { %709 = shalt.err (!%p706_p8)
}
  0x55   : > { %s710_s30 = sshra.s32 %s166_s6, 4  ;;  %s805_s16 = smov [#allocation5]   ;;  %s711_s30 = int_to_ptr.vmem [resolvable:$true] %s710_s30 }
  0x56   : > { %s717_s17 = scalar_lea.vmem %s711_s30, %s693_s24  ;;  %s721_s27 = scalar_lea.vmem %s805_s16, 48 }
  0x57   : > { %p718_p12 = scmp.ne.s32.totalorder %s711_s30, %s717_s17  ;;  %p723_p10 = scmp.lt.s32.totalorder %s721_s27, %s717_s17 }
  0x59   : > { %p719_p0 = pnand %p718_p12, %p940_p5 }
  0x5b   : > { %p720_p1 = pneg %p719_p0 }
  0x5d   : > { %p725_p11 = pnand %p723_p10, %p720_p1 }
  0x5f   : > { %728 = shalt.err (!%p725_p11)
}
  0x60   : > { %s806_s25 = smov 128   ;;  %s807_s28 = smov 8  }
  0x61   : > { %171 = dma.hbm_to_vmem [thread:$0]  (%p940_p5), %s952_s23, %s570_s7, %s166_s6, %s937_s14, %s806_s25, %s806_s25, %s807_s28  }
  0x62 PF: > { %p571_p13 = scmp.ge.s32.totalorder %s800_s12, 1  ;;  %p173_p2 = scmp.lt.s32.totalorder %s800_s12, 3 }
  0x64   : > { %p174_p3 = pnand %p571_p13, %p173_p2 }
  0x65   : > { %s980_s24 = sand.u32 (!%p174_p3), 1, %s792_s10  }
  0x66   : > { %177 = sbr.rel (%p174_p3) target bundleno = 201 (0xc9), region = 28  ;;  %s180_s5 = scalar_lea.sflag (!%p174_p3), [#allocation3], %s980_s24 }
  0x67   : > { %s581_s29 = smul.u32 (!%p174_p3), 24, %s980_s24 }
  0x69   : > { %s984_s19 = scalar_lea.vmem (!%p174_p3), [#allocation2], %s581_s29 }
  0x6b   : > { %775 = dma.done.wait (%p867_p6), %s180_s5, 384  }
  0x6c   : > { %777 = vsyncadd (%p867_p6), %s180_s5, 4294966912  ;;  %s190_s3 = scalar_lea.sflag [#allocation6], %s980_s24  ;;  %s193_s14 = scalar_lea.vmem [#allocation5], %s581_s29 }
  0x6d   : > { %779 = dma.done.wait (%p867_p6), %s190_s3, 384  }
  0x6e   : > { %781 = vsyncadd (%p867_p6), %s190_s3, 4294966912  ;;  %v236_v0 = vlaneseq  ;;  %s240_s6 = smul.u32 24, %s845_s13  ;;  %v233_v8 = vld [vmem:[%s193_s14] sm:$0xff]  ;;  %v234_v9 = vld [vmem:[%s193_s14 + $0x8] sm:$0xff]  ;;  %v808_v15 = vmov 0.0   ;;  %s572_s20 = sshll.u32 %s980_s24, 2 }
  0x6f   : > { %v235_v10 = vld [vmem:[%s193_s14 + $0x10] sm:$0xff]  ;;  %v231_v20 = vld [vmem:[%s984_s19 + $0x8] sm:$0xff]  ;;  %v232_v23 = vld [vmem:[%s984_s19 + $0x10] sm:$0xff]  ;;  %s1037_s7 = scalar_lea.vmem [#allocation7], %s572_s20  ;;  %s574_s23 = sshll.u32 %s845_s13, 2 }
  0x70   : > { %v237_v1 = vshrl.u32 %v236_v0, 7  ;;  %v241_v2 = vstv %s240_s6  ;;  %v230_v17 = vld [vmem:[%s984_s19] sm:$0xff]  ;;  %v1011_v32 = vadd.f32 1e-06, %v231_v20  ;;  %v1020_v39 = vadd.f32 1e-06, %v232_v23  ;;  %s460_s26 = scalar_lea.hbm %s1131_s2, %s574_s23 }
  0x71   : > { %v1009_v28 = vadd.f32 1e-06, %v230_v17  ;;  %s462_s30 = sshll.u32 %s1037_s7, 4  ;;  %s464_s17 = sshll.u32 %s460_s26, 4  ;;  %s463_s30 = int_to_ptr.vmem [resolvable:$true] %s462_s30  ;;  %s465_s17 = int_to_ptr.hbm [resolvable:$true] %s464_s17 }
  0x72   : > { %v238_v3 = vadd.s32 8, %v237_v1  ;;  %v239_v4 = vadd.s32 16, %v237_v1  ;;  %v242_v5 = vadd.s32 %v241_v2, %v237_v1  ;;  %s450_s16 = scalar_lea.sflag [#allocation4], %s980_s24  ;;  %s744_s27 = sshra.s32 %s465_s17, 4  ;;  %s745_s27 = int_to_ptr.hbm [resolvable:$true] %s744_s27 }
  0x73   : > { %vm294_vm13 = vcmp.eq.f32.partialorder %v1009_v28, inf  ;;  %s746_s25 = scalar_lea.hbm %s745_s27, 4  ;;  %s750_s29 = scalar_lea.hbm %s1131_s2, 8 }
  0x74   : > { %v243_v6 = vadd.s32 %v241_v2, %v238_v3  ;;  %v244_v7 = vadd.s32 %v241_v2, %v239_v4  ;;  %vm245_vm0 = vcmp.lt.s32.totalorder %v242_v5, 38  ;;  %p747_p6 = scmp.ne.s32.totalorder %s745_s27, %s746_s25  ;;  %p751_p7 = scmp.lt.s32.totalorder %s745_s27, %s1131_s2 }
  0x75   : > { %v248_v11 = vsel %vm245_vm0, %v233_v8, nan  ;;  %vm296_vm0 = vcmp.eq.f32.partialorder %v1009_v28, 0.0  ;;  %p752_p8 = scmp.lt.s32.totalorder %s750_s29, %s746_s25 }
  0x76   : > { %vm246_vm1 = vcmp.lt.s32.totalorder %v243_v6, 38  ;;  %vm247_vm2 = vcmp.lt.s32.totalorder %v244_v7, 38  ;;  %vm251_vm3 = vcmp.eq.f32.partialorder %v248_v11, %v248_v11  ;;  %v996_v14 = vadd.f32 1e-06, %v248_v11  ;;  %p748_p5 = pnand %p747_p6, %p872_p9 }
  0x77   : > { %v249_v12 = vsel %vm246_vm1, %v234_v9, nan  ;;  %v250_v13 = vsel %vm247_vm2, %v235_v10, nan  ;;  %v257_v16 = vsel %vm251_vm3, 1.0, %v808_v15  ;;  %v254_v24 = vsub.f32 %v230_v17, %v248_v11  ;;  %p753_p12 = por %p752_p8, %p751_p7 }
  0x78   : > { %vm252_vm4 = vcmp.eq.f32.partialorder %v249_v12, %v249_v12  ;;  %vm253_vm5 = vcmp.eq.f32.partialorder %v250_v13, %v250_v13  ;;  %v1003_v22 = vadd.f32 1e-06, %v249_v12  ;;  %v255_v25 = vsub.f32 %v231_v20, %v249_v12  ;;  %p749_p4 = pneg %p748_p5 }
  0x79   : > { %v258_v18 = vsel %vm252_vm4, 1.0, %v808_v15  ;;  %v259_v19 = vsel %vm253_vm5, 1.0, %v808_v15  ;;  %v1006_v26 = vadd.f32 1e-06, %v250_v13  ;;  %628 = vrsqrt.f32 %v996_v14 }
  0x7a   : > { %v260_v21 = vadd.f32 %v258_v18, %v257_v16  ;;  %v256_v27 = vsub.f32 %v232_v23, %v250_v13  ;;  %v269_v30 = vmul.f32 %v254_v24, %v254_v24  ;;  %v270_v31 = vmul.f32 %v255_v25, %v255_v25  ;;  %p754_p0 = pnand %p753_p12, %p749_p4 }
  0x7b   : > { %630 = vrsqrt.f32 %v1009_v28  ;;  %vm419_vm6 = vcmp.ge.f32.partialorder %v996_v14, 0.0  ;;  %vm420_vm7 = vcmp.ge.f32.partialorder %v1003_v22, 0.0  ;;  %vm421_vm8 = vcmp.ge.f32.partialorder %v1006_v26, 0.0 }
  0x7c   : > { %v261_v29 = vadd.f32 %v260_v21, %v259_v19  ;;  %v271_v33 = vmul.f32 %v256_v27, %v256_v27  ;;  %632 = vrsqrt.f32 %v1003_v22  ;;  %v272_v35 = vsel %vm251_vm3, %v269_v30, 0.0 }
  0x7d   : > { %v273_v36 = vsel %vm252_vm4, %v270_v31, 0.0  ;;  %v422_v41 = vsel %vm419_vm6, 1.0, %v808_v15  ;;  %v423_v42 = vsel %vm420_vm7, 1.0, %v808_v15  ;;  %v424_v43 = vsel %vm421_vm8, 1.0, %v808_v15 }
  0x7e   : > { %v262_v34 = vrot.slane %v261_v29, 4  ;;  %v274_v37 = vsel %vm253_vm5, %v271_v33, 0.0  ;;  %v275_v38 = vadd.f32 %v273_v36, %v272_v35  ;;  %634 = vrsqrt.f32 %v1011_v32 }
  0x7f   : > { %v629_v44 = vpop.eup %628  ;;  %v425_v46 = vadd.f32 %v423_v42, %v422_v41  ;;  %636 = vrsqrt.f32 %v1020_v39  ;;  %vm336_vm9 = vcmp.eq.f32.partialorder %v996_v14, inf  ;;  %v339_v18 = vand.u32 2147483648, %v996_v14 }
  0x80   : > { %v263_v40 = vadd.f32 %v262_v34, %v261_v29  ;;  %v276_v45 = vadd.f32 %v275_v38, %v274_v37  ;;  %v330_v56 = vmul.f32 %v629_v44, %v996_v14  ;;  %638 = vrsqrt.f32 %v1006_v26 }
  0x81   : > { %v631_v48 = vpop.eup %630  ;;  %v426_v50 = vadd.f32 %v425_v46, %v424_v43  ;;  %vm338_vm10 = vcmp.eq.f32.partialorder %v996_v14, 0.0  ;;  %vm348_vm11 = vcmp.eq.f32.partialorder %v1003_v22, inf  ;;  %v351_v36 = vand.u32 2147483648, %v1003_v22 }
  0x82   : > { %v264_v47 = vrot.slane %v263_v40, 2  ;;  %v277_v49 = vrot.slane %v276_v45, 4  ;;  %v633_v51 = vpop.eup %632  ;;  %v288_v55 = vmul.f32 %v631_v48, %v1009_v28  ;;  %v331_v61 = vmul.f32 %v629_v44, %v330_v56 }
  0x83   : > { %v427_v54 = vrot.slane %v426_v50, 4  ;;  %v342_v5 = vmul.f32 %v633_v51, %v1003_v22  ;;  %vm350_vm12 = vcmp.eq.f32.partialorder %v1003_v22, 0.0  ;;  %vm360_vm14 = vcmp.eq.f32.partialorder %v1006_v26, inf }
  0x84   : > { %v265_v52 = vadd.f32 %v264_v47, %v263_v40  ;;  %v278_v53 = vadd.f32 %v277_v49, %v276_v45  ;;  %v635_v58 = vpop.eup %634  ;;  %v289_v2 = vmul.f32 %v631_v48, %v288_v55  ;;  %v332_v3 = vmul.f32 0.5, %v331_v61 }
  0x85   : > { %v428_v60 = vadd.f32 %v427_v54, %v426_v50  ;;  %v1035_v63 = vpop.eup %636  ;;  %v300_v4 = vmul.f32 %v635_v58, %v1011_v32  ;;  %v343_v10 = vmul.f32 %v633_v51, %v342_v5  ;;  %vm362_vm15 = vcmp.eq.f32.partialorder %v1006_v26, 0.0 }
  0x86   : > { %v266_v57 = vrot.slane %v265_v52, 1  ;;  %v279_v59 = vrot.slane %v278_v53, 2  ;;  %v333_v8 = vsub.f32 1.5, %v332_v3  ;;  %v312_v9 = vmul.f32 %v1035_v63, %v1020_v39  ;;  %v639_v11 = vpop.eup %638 }
  0x87   : > { %v429_v1 = vrot.slane %v428_v60, 2  ;;  %v290_v15 = vmul.f32 0.5, %v289_v2  ;;  %v301_v17 = vmul.f32 %v635_v58, %v300_v4  ;;  %v344_v19 = vmul.f32 0.5, %v343_v10 }
  0x88   : > { %v267_v62 = vadd.f32 %v266_v57, %v265_v52  ;;  %v280_v0 = vadd.f32 %v279_v59, %v278_v53  ;;  %v334_v16 = vmul.f32 %v629_v44, %v333_v8  ;;  %v313_v23 = vmul.f32 %v1035_v63, %v312_v9 }
  0x89   : > { %v430_v7 = vadd.f32 %v429_v1, %v428_v60  ;;  %v345_v24 = vsub.f32 1.5, %v344_v19  ;;  %v354_v25 = vmul.f32 %v639_v11, %v1006_v26  ;;  %v291_v27 = vsub.f32 1.5, %v290_v15 }
  0x8a   : > { %268 = vst [vmem:[%s1037_s7] sm:$0x1] %v267_v62  ;;  %v281_v6 = vrot.slane %v280_v0, 1  ;;  %v335_v21 = vmul.f32 %v334_v16, %v996_v14  ;;  %v302_v30 = vmul.f32 0.5, %v301_v17  ;;  %v314_v35 = vmul.f32 0.5, %v313_v23 }
  0x8b   : > { %v431_v13 = vrot.slane %v430_v7, 1  ;;  %v346_v33 = vmul.f32 %v633_v51, %v345_v24  ;;  %v355_v34 = vmul.f32 %v639_v11, %v354_v25  ;;  %v292_v38 = vmul.f32 %v631_v48, %v291_v27 }
  0x8c   : > { %v282_v12 = vadd.f32 %v281_v6, %v280_v0  ;;  %v337_v29 = vsel %vm336_vm9, %v996_v14, %v335_v21  ;;  %v303_v42 = vsub.f32 1.5, %v302_v30  ;;  %v315_v47 = vsub.f32 1.5, %v314_v35 }
  0x8d   : > { %v432_v20 = vadd.f32 %v431_v13, %v430_v7  ;;  %v340_v31 = vsel %vm338_vm10, %v339_v18, %v337_v29  ;;  %v347_v40 = vmul.f32 %v346_v33, %v1003_v22  ;;  %v356_v41 = vmul.f32 0.5, %v355_v34 }
  0x8e   : > { %283 = vst [vmem:[%s1037_s7 + $0x1] sm:$0x1] %v282_v12  ;;  %v365_v37 = vadd.f32 0.1, %v340_v31  ;;  %v293_v46 = vmul.f32 %v292_v38, %v1009_v28  ;;  %v304_v51 = vmul.f32 %v635_v58, %v303_v42  ;;  %v363_v48 = vand.u32 2147483648, %v1006_v26 }
  0x8f   : > { %433 = vst [vmem:[%s1037_s7 + $0x2] sm:$0x1] %v432_v20  ;;  %v349_v43 = vsel %vm348_vm11, %v1003_v22, %v347_v40  ;;  %v357_v44 = vsub.f32 1.5, %v356_v41  ;;  %v297_v54 = vand.u32 2147483648, %v1009_v28  ;;  %vm306_vm1 = vcmp.eq.f32.partialorder %v1011_v32, inf }
  0x90   : > { %640 = vrcp.f32 %v365_v37  ;;  %v352_v45 = vsel %vm350_vm12, %v351_v36, %v349_v43  ;;  %v295_v55 = vsel %vm294_vm13, %v1009_v28, %v293_v46  ;;  %v316_v56 = vmul.f32 %v1035_v63, %v315_v47 }
  0x91   : > { %v358_v49 = vmul.f32 %v639_v11, %v357_v44  ;;  %v366_v50 = vadd.f32 0.1, %v352_v45  ;;  %v305_v59 = vmul.f32 %v304_v51, %v1011_v32  ;;  %vm373_vm2 = vweird.f32 %v365_v37 }
  0x92   : > { %v379_v61 = vand.u32 2147483648, %v365_v37  ;;  %v377_v1 = vand.u32 2147483647, %v365_v37  ;;  %v298_v2 = vsel %vm296_vm0, %v297_v54, %v295_v55  ;;  %vm308_vm4 = vcmp.eq.f32.partialorder %v1011_v32, 0.0 }
  0x93   : > { %v359_v52 = vmul.f32 %v358_v49, %v1006_v26  ;;  %642 = vrcp.f32 %v366_v50  ;;  %v309_v28 = vand.u32 2147483648, %v1011_v32  ;;  %vm318_vm5 = vcmp.eq.f32.partialorder %v1020_v39, inf }
  0x94   : > { %v307_v4 = vsel %vm306_vm1, %v1011_v32, %v305_v59  ;;  %v317_v5 = vmul.f32 %v316_v56, %v1020_v39  ;;  %v380_v6 = vor.u32 1.1754944e-38, %v379_v61  ;;  %v323_v8 = vadd.f32 0.1, %v298_v2 }
  0x95   : > { %v361_v57 = vsel %vm360_vm14, %v1006_v26, %v359_v52  ;;  %vm378_vm10 = vcmp.eq.f32.partialorder %v377_v1, 8.507059e+37  ;;  %v394_v10 = vand.u32 2147483648, %v366_v50  ;;  %vm388_vm11 = vweird.f32 %v366_v50 }
  0x96   : > { %v641_v53 = vpop.eup %640  ;;  %v364_v60 = vsel %vm362_vm15, %v363_v48, %v361_v57  ;;  %v392_v12 = vand.u32 2147483647, %v366_v50  ;;  %v310_v13 = vsel %vm308_vm4, %v309_v28, %v307_v4  ;;  %vm320_vm13 = vcmp.eq.f32.partialorder %v1020_v39, 0.0 }
  0x97   : > { %v369_v58 = vmul.f32 %v641_v53, %v365_v37  ;;  %v367_v62 = vadd.f32 0.1, %v364_v60  ;;  %vm374_vm3 = vweird.f32 %v641_v53  ;;  %v319_v19 = vsel %vm318_vm5, %v1020_v39, %v317_v5 }
  0x98   : > { %vm375_vm9 = vmor %vm373_vm2, %vm374_vm3  ;;  %v321_v20 = vand.u32 2147483648, %v1020_v39  ;;  %v395_v23 = vor.u32 1.1754944e-38, %v394_v10  ;;  %v324_v24 = vadd.f32 0.1, %v310_v13  ;;  %vm393_vm15 = vcmp.eq.f32.partialorder %v392_v12, 8.507059e+37 }
  0x99   : > { %v370_v0 = vsub.f32 1.0, %v369_v58  ;;  %v643_v3 = vpop.eup %642  ;;  %644 = vrcp.f32 %v367_v62  ;;  %vm403_vm0 = vweird.f32 %v367_v62  ;;  %v409_v27 = vand.u32 2147483648, %v367_v62 }
  0x9a   : > { %v384_v7 = vmul.f32 %v643_v3, %v366_v50  ;;  %vm389_vm12 = vweird.f32 %v643_v3  ;;  %v407_v31 = vand.u32 2147483647, %v367_v62  ;;  %v322_v33 = vsel %vm320_vm13, %v321_v20, %v319_v19 }
  0x9b   : > { %v371_v63 = vmul.f32 %v641_v53, %v370_v0  ;;  %vm390_vm14 = vmor %vm388_vm11, %vm389_vm12  ;;  %v410_v37 = vor.u32 1.1754944e-38, %v409_v27  ;;  %v325_v38 = vadd.f32 0.1, %v322_v33 }
  0x9c   : > { %v385_v11 = vsub.f32 1.0, %v384_v7  ;;  %vm408_vm3 = vcmp.eq.f32.partialorder %v407_v31, 8.507059e+37 }
  0x9d   : > { %v372_v9 = vadd.f32 %v641_v53, %v371_v63 }
  0x9e   : > { %v386_v17 = vmul.f32 %v643_v3, %v385_v11 }
  0x9f   : > { %v376_v15 = vsel %vm375_vm9, %v641_v53, %v372_v9  ;;  %v645_v18 = vpop.eup %644 }
  0xa0   : > { %v381_v16 = vsel %vm378_vm10, %v380_v6, %v376_v15  ;;  %v387_v25 = vadd.f32 %v643_v3, %v386_v17  ;;  %v399_v32 = vmul.f32 %v645_v18, %v367_v62  ;;  %vm404_vm1 = vweird.f32 %v645_v18 }
  0xa1   : > { %v382_v21 = vmul.f32 %v381_v16, %v323_v8  ;;  %vm405_vm2 = vmor %vm403_vm0, %vm404_vm1 }
  0xa2   : > { %v391_v29 = vsel %vm390_vm14, %v643_v3, %v387_v25  ;;  %v400_v30 = vsub.f32 1.0, %v399_v32 }
  0xa3   : > { %646 = vlog2.f32 %v382_v21  ;;  %v396_v34 = vsel %vm393_vm15, %v395_v23, %v391_v29 }
  0xa4   : > { %v397_v35 = vmul.f32 %v396_v34, %v324_v24  ;;  %v401_v36 = vmul.f32 %v645_v18, %v400_v30 }
  0xa6   : > { %v402_v40 = vadd.f32 %v645_v18, %v401_v36  ;;  %648 = vlog2.f32 %v397_v35 }
  0xa8   : > { %v406_v42 = vsel %vm405_vm2, %v645_v18, %v402_v40 }
  0xa9   : > { %v647_v41 = vpop.eup %646  ;;  %v411_v43 = vsel %vm408_vm3, %v410_v37, %v406_v42 }
  0xaa   : > { %v414_v44 = vmul.f32 0.6931472, %v647_v41  ;;  %v412_v45 = vmul.f32 %v411_v43, %v325_v38 }
  0xac   : > { %v649_v46 = vpop.eup %648  ;;  %650 = vlog2.f32 %v412_v45  ;;  %v434_v39 = vmul.f32 %v414_v44, %v414_v44 }
  0xad   : > { %v416_v47 = vmul.f32 0.6931472, %v649_v46 }
  0xae   : > { %v437_v50 = vsel %vm419_vm6, %v434_v39, 0.0 }
  0xaf   : > { %v435_v49 = vmul.f32 %v416_v47, %v416_v47 }
  0xb1   : > { %v438_v51 = vsel %vm420_vm7, %v435_v49, 0.0 }
  0xb2   : > { %v651_v48 = vpop.eup %650  ;;  %v440_v53 = vadd.f32 %v438_v51, %v437_v50 }
  0xb3   : > { %v418_v52 = vmul.f32 0.6931472, %v651_v48 }
  0xb5   : > { %v436_v54 = vmul.f32 %v418_v52, %v418_v52 }
  0xb7   : > { %v439_v55 = vsel %vm421_vm8, %v436_v54, 0.0 }
  0xb8   : > { %v441_v56 = vadd.f32 %v440_v53, %v439_v55 }
  0xba   : > { %v442_v57 = vrot.slane %v441_v56, 4 }
  0xbc   : > { %v443_v58 = vadd.f32 %v442_v57, %v441_v56 }
  0xbe   : > { %v444_v59 = vrot.slane %v443_v58, 2 }
  0xc0   : > { %v445_v14 = vadd.f32 %v444_v59, %v443_v58 }
  0xc2   : > { %v446_v22 = vrot.slane %v445_v14, 1 }
  0xc4   : > { %v447_v60 = vadd.f32 %v446_v22, %v445_v14 }
  0xc6   : > { %448 = vst [vmem:[%s1037_s7 + $0x3] sm:$0x1] %v447_v60 }
  0xc7   : > { %757 = shalt.err (!%p754_p0)
}
  0xc8   : > { %584 = dma.vmem_to_hbm [thread:$0]  (%p872_p9), %s463_s30, 64, %s465_s17, %s450_s16  }
  0xc9 PF: > { %s476_s24 = sand.u32 1, %s788_s9   ;;  %p1139_p1 = scmp.ne.s32.totalorder %s1136_s22, 0 }
  0xca   : > { %p1140_p10 = scmp.ge.s32.totalorder %s800_s12, 2  ;;  %s477_s3 = scalar_lea.sflag [#allocation4], %s476_s24 }
  0xcc   : > { %p587_p11 = pnand %p1140_p10, %p1139_p1 }
  0xce   : > { %p588_p13 = pneg %p587_p11 }
  0xd0   : > { %783 = dma.done.wait (%p588_p13), %s477_s3, 64  }
  0xd1   : > { %785 = vsyncadd (%p588_p13), %s477_s3, 4294967232  ;;  %p18_p2 = scmp.ge.s32.totalorder %s849_s15, 4   ;;  %s1141_s9 = smov %s792_s10 }
  0xd2   : > { %s1142_s10 = smov %s796_s11  ;;  %s1143_s11 = smov %s861_s18 }
  0xd3   : > { %s1144_s12 = smov %s849_s15  ;;  %20 = sbr.rel (!%p18_p2) target bundleno = 7 (0x7), region = 86 }
  0xd8   :  { %483 = vsyncpa [#allocation3], 1 }
  0xd9   :  { %485 = vsyncpa [#allocation3 + $0x1], 1 }
  0xda   :  { %486 = vsyncpa [#allocation6], 1 }
  0xdb   :  { %488 = vsyncpa [#allocation6 + $0x1], 1 }
  0xdc   :  { %489 = vsyncpa [#allocation4], 1 }
  0xdd   :  { %491 = vsyncpa [#allocation4 + $0x1], 1 }

</bundles_post_ra>
